<compile_context>
chip_gen: v7x
topology: tpu7x:2x2x1
jax: 0.10.0
libtpu: 0.0.40
codegen_flags: <defaults>
</compile_context>

<pallas_src>
import math

import numpy as np

import jax
import jax.numpy as jnp
from jax import lax
from jax.experimental import pallas as pl
from jax.experimental.pallas import tpu as pltpu


# -----------------------------------------------------------------------------
# Kernel 1: one GNN layer    x' = x + A_norm @ relu(x @ W + b)
#   grid = (i node-tile ["parallel"], k source-node-tile ["arbitrary"])
#   A_norm already carries the 1/(M-1) row scaling and is bf16.
#   h_k is recomputed per i-tile; for very large N hoist it into its own pass.
# -----------------------------------------------------------------------------
def _gnn_layer_kernel(x_i_ref, x_k_ref, a_ref, w_ref, b_ref, o_ref, acc_ref):
    k = pl.program_id(1)

    @pl.when(k == 0)
    def _():
        acc_ref[...] = jnp.zeros_like(acc_ref)

    # h_k = relu(X_k @ W + b)   (bf16 MXU operands, f32 accumulate)
    h = jnp.dot(x_k_ref[...].astype(jnp.bfloat16), w_ref[...],
                preferred_element_type=jnp.float32) + b_ref[...]
    h = jnp.maximum(h, 0.0)

    acc_ref[...] += jnp.dot(a_ref[...], h.astype(jnp.bfloat16),
                            preferred_element_type=jnp.float32)

    @pl.when(k == pl.num_programs(1) - 1)
    def _():
        o_ref[...] = x_i_ref[...] + acc_ref[...]      # residual kept in f32


def gnn_layer(x, a_norm_bf16, w_bf16, bias, *, tile_n=128):
    n, d = x.shape
    grid = (n // tile_n, n // tile_n)
    return pl.pallas_call(
        _gnn_layer_kernel,
        out_shape=jax.ShapeDtypeStruct((n, d), jnp.float32),
        grid=grid,
        in_specs=[
            pl.BlockSpec((tile_n, d), lambda i, k: (i, 0)),       # x (residual)
            pl.BlockSpec((tile_n, d), lambda i, k: (k, 0)),       # x (linear in)
            pl.BlockSpec((tile_n, tile_n), lambda i, k: (i, k)),  # A_norm block
            pl.BlockSpec((d, d), lambda i, k: (0, 0)),            # W   (bf16)
            pl.BlockSpec((1, d), lambda i, k: (0, 0)),            # bias (f32)
        ],
        out_specs=pl.BlockSpec((tile_n, d), lambda i, k: (i, 0)),
        scratch_shapes=[pltpu.VMEM((tile_n, d), jnp.float32)],
        compiler_params=pltpu.CompilerParams(
            dimension_semantics=("parallel", "arbitrary"),
            vmem_limit_bytes=32 * 1024 * 1024,
        ),
    )(x, x, a_norm_bf16, w_bf16, bias)


# -----------------------------------------------------------------------------
# Kernel 2: per-molecule mean pooling via scalar-prefetched segment offsets
#   (replaces the dense [G, N] pooling matrix).  grid = (node K tiles,)
# -----------------------------------------------------------------------------
def _segment_mean_kernel(starts_ref, sizes_ref, x_ref, o_ref):
    k = pl.program_id(0)
    tile_n = x_ref.shape[0]
    num_seg = o_ref.shape[0]

    @pl.when(k == 0)
    def _():
        o_ref[...] = jnp.zeros_like(o_ref)

    x = x_ref[...]
    row = k * tile_n + lax.broadcasted_iota(jnp.int32, x.shape, 0)
    for g in range(num_seg):                       # static, small G
        start = starts_ref[g]
        size = sizes_ref[g]
        inside = (row >= start) & (row < start + size)
        contrib = jnp.sum(jnp.where(inside, x, 0.0), axis=0, keepdims=True)
        o_ref[g:g + 1, :] = o_ref[g:g + 1, :] + contrib

    @pl.when(k == pl.num_programs(0) - 1)
    def _():
        for g in range(num_seg):
            inv = 1.0 / sizes_ref[g].astype(jnp.float32)
            o_ref[g:g + 1, :] = o_ref[g:g + 1, :] * inv


def segment_mean(x, seg_starts, seg_sizes, *, tile_n=128):
    n, d = x.shape
    num_seg = int(seg_starts.shape[0])
    return pl.pallas_call(
        _segment_mean_kernel,
        out_shape=jax.ShapeDtypeStruct((num_seg, d), jnp.float32),
        grid_spec=pltpu.PrefetchScalarGridSpec(
            num_scalar_prefetch=2,
            grid=(n // tile_n,),
            in_specs=[pl.BlockSpec((tile_n, d),
                                   lambda k, starts, sizes: (k, 0))],
            out_specs=pl.BlockSpec((num_seg, d),
                                   lambda k, starts, sizes: (0, 0)),
        ),
        compiler_params=pltpu.CompilerParams(
            dimension_semantics=("arbitrary",),
            vmem_limit_bytes=32 * 1024 * 1024,
        ),
    )(seg_starts, seg_sizes, x)


# -----------------------------------------------------------------------------
# Kernel 3: ProtCNN (conv stack as banded MXU matmuls) + compound attention.
#   grid = (protein/compound pair,)  ["parallel"]
# -----------------------------------------------------------------------------
def _row_shift(x, shift):
    """y[t] = x[t + shift], zero padded (static shift in [-w, w])."""
    if shift == 0:
        return x
    pad = jnp.zeros((abs(shift), x.shape[1]), x.dtype)
    if shift > 0:
        return jnp.concatenate([x[shift:, :], pad], axis=0)
    return jnp.concatenate([pad, x[:shift, :]], axis=0)


def _prot_cnn_attn_kernel(prot_ref, bands_ref, cbias_ref, watt_ref, batt_ref,
                          comp_ref, o_ref):
    num_layers = bands_ref.shape[0]
    num_taps = bands_ref.shape[1]
    half = (num_taps - 1) // 2

    x = prot_ref[0]                                   # (T, D) f32
    for layer in range(num_layers):                   # static unroll
        acc = jnp.zeros_like(x)
        for s in range(num_taps):
            xs = _row_shift(x, s - half)
            acc = acc + jnp.dot(xs.astype(jnp.bfloat16), bands_ref[layer, s],
                                preferred_element_type=jnp.float32)
        x = jnp.maximum(acc + cbias_ref[layer], 0.0)  # conv bias + ReLU (f32)

    # Compound-conditioned attention (Tsubaki), shared W_attention:
    c = comp_ref[0]                                   # (1, D) f32
    h = jnp.maximum(jnp.dot(c.astype(jnp.bfloat16), watt_ref[...],
                            preferred_element_type=jnp.float32) + batt_ref[...],
                    0.0)                              # (1, D)
    hs = jnp.maximum(jnp.dot(x.astype(jnp.bfloat16), watt_ref[...],
                             preferred_element_type=jnp.float32) + batt_ref[...],
                     0.0)                             # (T, D)
    weights = jnp.tanh(jnp.sum(hs * h, axis=-1, keepdims=True))   # (T, 1)
    ys = weights * hs                                             # (T, D)
    o_ref[...] = jnp.mean(ys, axis=0, keepdims=True)[None]        # (1, 1, D)


def prot_cnn_attention(prot_emb, bands_bf16, conv_bias, watt_bf16, b_att,
                       comp_out):
    bsz, t, d = prot_emb.shape
    lcnn, taps = bands_bf16.shape[0], bands_bf16.shape[1]
    out = pl.pallas_call(
        _prot_cnn_attn_kernel,
        out_shape=jax.ShapeDtypeStruct((bsz, 1, d), jnp.float32),
        grid=(bsz,),
        in_specs=[
            pl.BlockSpec((1, t, d), lambda b: (b, 0, 0)),            # protein
            pl.BlockSpec((lcnn, taps, d, d), lambda b: (0, 0, 0, 0)),  # bands
            pl.BlockSpec(memory_space=pltpu.MemorySpace.SMEM),       # conv bias
            pl.BlockSpec((d, d), lambda b: (0, 0)),                  # W_att
            pl.BlockSpec((1, d), lambda b: (0, 0)),                  # b_att
            pl.BlockSpec((1, 1, d), lambda b: (b, 0, 0)),            # compound
        ],
        out_specs=pl.BlockSpec((1, 1, d), lambda b: (b, 0, 0)),
        compiler_params=pltpu.CompilerParams(
            dimension_semantics=("parallel",),
            vmem_limit_bytes=32 * 1024 * 1024,
        ),
    )(prot_emb, bands_bf16, conv_bias, watt_bf16, b_att,
      comp_out.reshape(bsz, 1, d))
    return out[:, 0, :]


# -----------------------------------------------------------------------------
# ProtCnnForward wrapper: gnet -> prot2vec -> pcnn -> concat.
# -----------------------------------------------------------------------------
def prot_cnn_forward(comp_fingerprints, a_norm, prot_words, seg_starts,
                     seg_sizes, params):
    # ---- compound branch (GraphNeuralNet) ------------------------------
    # TODO(synk): nn.Embedding gathers are left as plain-JAX jnp.take glue
    #             rather than an in-kernel DMA gather.
    x = jnp.take(params["comp_emb"], comp_fingerprints,
                 axis=0).astype(jnp.float32)                    # (Np, D)
    a_bf16 = a_norm.astype(jnp.bfloat16)
    w_gnn = params["w_gnn"].astype(jnp.bfloat16)
    for layer in range(w_gnn.shape[0]):
        x = gnn_layer(x, a_bf16, w_gnn[layer], params["b_gnn"][layer])
    comp_out = segment_mean(x, seg_starts, seg_sizes)           # (G, D)

    # ---- protein branch (prot2vec + ProtCNN attention) -----------------
    prot_emb = jnp.take(params["prot_emb"], prot_words,
                        axis=0).astype(jnp.float32)             # (B, T, D)
    prot_out = prot_cnn_attention(
        prot_emb,
        params["conv_bands"].astype(jnp.bfloat16),
        params["conv_bias"],
        params["w_att"].astype(jnp.bfloat16),
        params["b_att"],
        comp_out,
    )                                                           # (B, D)

    # ---- torch.cat([comp_out, prot_out], dim=1) -------------------------
    return jnp.concatenate([comp_out, prot_out], axis=1)        # (G, 2D)


# -----------------------------------------------------------------------------
# Pure-JAX f32 reference (mirrors the PyTorch forward) for correctness check.
# -----------------------------------------------------------------------------
def reference_forward(comp_fingerprints, adjacency, inv_m, prot_words,
                      seg_starts_py, seg_sizes_py, params):
    # GNN
    x = params["comp_emb"][comp_fingerprints]
    for layer in range(params["w_gnn"].shape[0]):
        h = jnp.maximum(x @ params["w_gnn"][layer] + params["b_gnn"][layer], 0.0)
        x = x + (adjacency @ h) * inv_m
    comp_out = jnp.stack([x[s:s + z].mean(axis=0)
                          for s, z in zip(seg_starts_py, seg_sizes_py)])

    # ProtCNN
    prot_emb = params["prot_emb"][prot_words]
    conv_k = params["conv_k"]
    conv_b = params["conv_bias"]
    half = (conv_k.shape[-1] - 1) // 2
    prot_rows = []
    for bidx in range(prot_emb.shape[0]):
        xs = prot_emb[bidx]
        t, d = xs.shape
        for layer in range(conv_k.shape[0]):
            xp = jnp.pad(xs, ((half, half), (half, half)))
            out = jnp.zeros_like(xs)
            for i in range(conv_k.shape[1]):
                for j in range(conv_k.shape[2]):
                    out = out + conv_k[layer, i, j] * xp[i:i + t, j:j + d]
            xs = jnp.maximum(out + conv_b[layer], 0.0)
        h = jnp.maximum(comp_out[bidx:bidx + 1] @ params["w_att"]
                        + params["b_att"], 0.0)                 # (1, D)
        hs = jnp.maximum(xs @ params["w_att"] + params["b_att"], 0.0)
        weights = jnp.tanh(hs @ h.T)                            # (T, 1)
        prot_rows.append((weights * hs).mean(axis=0))
    prot_out = jnp.stack(prot_rows)
    return jnp.concatenate([comp_out, prot_out], axis=1)


if __name__ == "__main__":
    # Shapes: D is a multiple of 128 lanes (MXU-friendly), node count padded to
    # the 128-node tile so the aggregation grid has multiple tiles per axis.
    D = 128
    seg_sizes = (70, 61, 58, 40)     # atoms per molecule (all >= 2: 1/(M-1) finite)
    G = len(seg_sizes)
    NUM_ATOMS = sum(seg_sizes)       # 229
    TILE_N = 128
    NP = ((NUM_ATOMS + TILE_N - 1) // TILE_N) * TILE_N   # 256 (padded nodes)
    L_GNN = 3
    NUM_FP = 50

    B = G                            # one protein per compound
    T = 256                          # protein sequence length (n-gram words)
    VOCAB = 30
    L_CNN = 2
    WIN = 2
    TAPS = 2 * WIN + 1

    key = jax.random.PRNGKey(0)
    (k_cemb, k_wg, k_bg, k_pemb, k_ck, k_cb, k_wa, k_ba,
     k_fp, k_adj, k_pw) = jax.random.split(key, 11)

    bound = 1.0 / math.sqrt(D)
    params = {
        "comp_emb": jax.random.normal(k_cemb, (NUM_FP, D), jnp.float32) * 0.1,
        # NOTE: GNN / attention weights are stored in (in, out) layout, i.e.
        # nn.Linear.weight.T -- transpose when importing real PyTorch weights.
        "w_gnn": jax.random.uniform(k_wg, (L_GNN, D, D), jnp.float32,
                                    -bound, bound),
        "b_gnn": jax.random.uniform(k_bg, (L_GNN, 1, D), jnp.float32,
                                    -0.05, 0.05),
        "prot_emb": jax.random.normal(k_pemb, (VOCAB, D), jnp.float32) * 0.1,
        "conv_k": jax.random.uniform(k_ck, (L_CNN, TAPS, TAPS), jnp.float32,
                                     -0.2, 0.2),
        "conv_bias": jax.random.uniform(k_cb, (L_CNN,), jnp.float32, -0.2, 0.2),
        "w_att": jax.random.uniform(k_wa, (D, D), jnp.float32, -bound, bound),
        "b_att": jax.random.uniform(k_ba, (1, D), jnp.float32, -0.05, 0.05),
    }

    # Banded [D, D] matrices: the (2w+1)x(2w+1) conv becomes TAPS MXU matmuls.
    # Built once at parameter-setup time (not per forward call).
    conv_k_np = np.asarray(params["conv_k"])
    bands = np.zeros((L_CNN, TAPS, D, D), np.float32)
    for layer in range(L_CNN):
        for i in range(TAPS):
            for m in range(-WIN, WIN + 1):
                bands[layer, i] += conv_k_np[layer, i, m + WIN] * np.eye(
                    D, k=-m, dtype=np.float32)
    params["conv_bands"] = jnp.asarray(bands)

    # Segment bookkeeping (starts/sizes, 1/(M-1) per node; padded rows -> 0).
    seg_starts_py = []
    inv_m = np.zeros((NP, 1), np.float32)
    blockmask = np.zeros((NP, NP), np.float32)
    start = 0
    for sz in seg_sizes:
        seg_starts_py.append(start)
        inv_m[start:start + sz, 0] = 1.0 / (sz - 1.0)
        blockmask[start:start + sz, start:start + sz] = 1.0
        start += sz
    seg_starts = jnp.asarray(seg_starts_py, jnp.int32)
    seg_sizes_arr = jnp.asarray(seg_sizes, jnp.int32)

    # Inputs: fingerprints, block-diagonal adjacency, protein word ids.
    fingerprints = jax.random.randint(k_fp, (NP,), 0, NUM_FP)
    a_raw = np.asarray(jax.random.bernoulli(k_adj, 0.15,
                                            (NP, NP))).astype(np.float32)
    a_raw = a_raw * blockmask
    adjacency_np = np.maximum(a_raw, a_raw.T)
    np.fill_diagonal(adjacency_np, 0.0)
    adjacency = jnp.asarray(adjacency_np)
    inv_m_j = jnp.asarray(inv_m)
    a_norm = adjacency * inv_m_j           # fold 1/(M-1) into A once (f32)
    prot_words = jax.random.randint(k_pw, (B, T), 0, VOCAB)

    out = prot_cnn_forward(fingerprints, a_norm, prot_words,
                           seg_starts, seg_sizes_arr, params)
    out = jax.block_until_ready(out)

    ref = reference_forward(fingerprints, adjacency, inv_m_j, prot_words,
                            seg_starts_py, seg_sizes, params)
    np.testing.assert_allclose(np.asarray(out), np.asarray(ref),
                               rtol=5e-2, atol=5e-3)
    assert out.shape == (G, 2 * D)
    print("KERNEL_OK")
</pallas_src>

<mosaic_0001>
module attributes {stable_mosaic.version = 11 : i64} {
  func.func @_gnn_layer_kernel(%arg0: i32, %arg1: i32, %arg2: memref<128x128xf32, #tpu.memory_space<vmem>>, %arg3: memref<128x128xf32, #tpu.memory_space<vmem>>, %arg4: memref<128x128xbf16, #tpu.memory_space<vmem>>, %arg5: memref<128x128xbf16, #tpu.memory_space<vmem>>, %arg6: memref<1x128xf32, #tpu.memory_space<vmem>>, %arg7: memref<128x128xf32, #tpu.memory_space<vmem>>, %arg8: memref<128x128xf32, #tpu.memory_space<vmem>>) attributes {dimension_semantics = [#tpu.dimension_semantics<parallel>, #tpu.dimension_semantics<arbitrary>], iteration_bounds = array<i64: 2, 2>, scalar_prefetch = 0 : i64, scratch_operands = 1 : i64, tpu.core_type = #tpu.core_type<tc>, window_params = [{transform_indices = @transform_0, window_bounds = array<i64: 128, 128>}, {transform_indices = @transform_1, window_bounds = array<i64: 128, 128>}, {transform_indices = @transform_2, window_bounds = array<i64: 128, 128>}, {pipeline_mode = #tpu.pipeline_mode<synchronous>, transform_indices = @transform_3, window_bounds = array<i64: 128, 128>}, {pipeline_mode = #tpu.pipeline_mode<synchronous>, transform_indices = @transform_4, window_bounds = array<i64: 1, 128>}, {transform_indices = @transform_5, window_bounds = array<i64: 128, 128>}]} {
    %c0_i32 = arith.constant 0 : i32
    %0 = arith.cmpi eq, %arg1, %c0_i32 : i32
    %1 = arith.extui %0 : i1 to i32
    %c0_i32_0 = arith.constant 0 : i32
    %2 = arith.cmpi ne, %1, %c0_i32_0 : i32
    scf.if %2 {
      %cst_15 = arith.constant 0.000000e+00 : f32
      %21 = vector.broadcast %cst_15 : f32 to vector<128x128xf32>
      %c0_16 = arith.constant 0 : index
      %c0_17 = arith.constant 0 : index
      %22 = vector.load %arg8[%c0_16, %c0_17] : memref<128x128xf32, #tpu.memory_space<vmem>>, vector<128x128xf32>
      tpu.vector_store %arg8[%c0_16, %c0_17], %21 {strides = array<i32>} : memref<128x128xf32, #tpu.memory_space<vmem>>, vector<128x128xf32>,
    } else {
    }
    %c0 = arith.constant 0 : index
    %c0_1 = arith.constant 0 : index
    %3 = vector.load %arg3[%c0, %c0_1] : memref<128x128xf32, #tpu.memory_space<vmem>>, vector<128x128xf32>
    %4 = arith.truncf %3 : vector<128x128xf32> to vector<128x128xbf16>
    %c0_2 = arith.constant 0 : index
    %c0_3 = arith.constant 0 : index
    %5 = vector.load %arg5[%c0_2, %c0_3] : memref<128x128xbf16, #tpu.memory_space<vmem>>, vector<128x128xbf16>
    %cst = arith.constant dense<0.000000e+00> : vector<128x128xf32>
    %6 = tpu.matmul %4, %5, %cst {dimension_numbers = #tpu.dot_dimension_numbers<[1], [0], [0], [1], [0, 0, 1, 1], [], []>} : vector<128x128xbf16>, vector<128x128xbf16>, vector<128x128xf32> -> vector<128x128xf32>
    %c0_4 = arith.constant 0 : index
    %c0_5 = arith.constant 0 : index
    %7 = vector.load %arg6[%c0_4, %c0_5] : memref<1x128xf32, #tpu.memory_space<vmem>>, vector<1x128xf32>
    %8 = vector.broadcast %7 : vector<1x128xf32> to vector<128x128xf32>
    %9 = arith.addf %6, %8 : vector<128x128xf32>
    %cst_6 = arith.constant 0.000000e+00 : f32
    %10 = vector.broadcast %cst_6 : f32 to vector<128x128xf32>
    %11 = arith.maximumf %9, %10 : vector<128x128xf32>
    %c0_7 = arith.constant 0 : index
    %c0_8 = arith.constant 0 : index
    %12 = vector.load %arg8[%c0_7, %c0_8] : memref<128x128xf32, #tpu.memory_space<vmem>>, vector<128x128xf32>
    %c0_9 = arith.constant 0 : index
    %c0_10 = arith.constant 0 : index
    %13 = vector.load %arg4[%c0_9, %c0_10] : memref<128x128xbf16, #tpu.memory_space<vmem>>, vector<128x128xbf16>
    %14 = arith.truncf %11 : vector<128x128xf32> to vector<128x128xbf16>
    %cst_11 = arith.constant dense<0.000000e+00> : vector<128x128xf32>
    %15 = tpu.matmul %13, %14, %cst_11 {dimension_numbers = #tpu.dot_dimension_numbers<[1], [0], [0], [1], [0, 0, 1, 1], [], []>} : vector<128x128xbf16>, vector<128x128xbf16>, vector<128x128xf32> -> vector<128x128xf32>
    %16 = arith.addf %12, %15 : vector<128x128xf32>
    %c0_12 = arith.constant 0 : index
    %c0_13 = arith.constant 0 : index
    %17 = vector.load %arg8[%c0_12, %c0_13] : memref<128x128xf32, #tpu.memory_space<vmem>>, vector<128x128xf32>
    tpu.vector_store %arg8[%c0_12, %c0_13], %16 {strides = array<i32>} : memref<128x128xf32, #tpu.memory_space<vmem>>, vector<128x128xf32>,
    %c1_i32 = arith.constant 1 : i32
    %18 = arith.cmpi eq, %arg1, %c1_i32 : i32
    %19 = arith.extui %18 : i1 to i32
    %c0_i32_14 = arith.constant 0 : i32
    %20 = arith.cmpi ne, %19, %c0_i32_14 : i32
    scf.if %20 {
      %c0_15 = arith.constant 0 : index
      %c0_16 = arith.constant 0 : index
      %21 = vector.load %arg2[%c0_15, %c0_16] : memref<128x128xf32, #tpu.memory_space<vmem>>, vector<128x128xf32>
      %c0_17 = arith.constant 0 : index
      %c0_18 = arith.constant 0 : index
      %22 = vector.load %arg8[%c0_17, %c0_18] : memref<128x128xf32, #tpu.memory_space<vmem>>, vector<128x128xf32>
      %23 = arith.addf %21, %22 : vector<128x128xf32>
      %c0_19 = arith.constant 0 : index
      %c0_20 = arith.constant 0 : index
      %24 = vector.load %arg7[%c0_19, %c0_20] : memref<128x128xf32, #tpu.memory_space<vmem>>, vector<128x128xf32>
      tpu.vector_store %arg7[%c0_19, %c0_20], %23 {strides = array<i32>} : memref<128x128xf32, #tpu.memory_space<vmem>>, vector<128x128xf32>,
    } else {
    }
    return
  }
  func.func @transform_0(%arg0: i32, %arg1: i32) -> (i32, i32) {
    %c0_i32 = arith.constant 0 : i32
    %c0_i32_0 = arith.constant 0 : i32
    return %arg0, %c0_i32 : i32, i32
  }
  func.func @transform_1(%arg0: i32, %arg1: i32) -> (i32, i32) {
    %c0_i32 = arith.constant 0 : i32
    %c0_i32_0 = arith.constant 0 : i32
    return %arg1, %c0_i32 : i32, i32
  }
  func.func @transform_2(%arg0: i32, %arg1: i32) -> (i32, i32) {
    %c0_i32 = arith.constant 0 : i32
    return %arg0, %arg1 : i32, i32
  }
  func.func @transform_3(%arg0: i32, %arg1: i32) -> (i32, i32) {
    %c0_i32 = arith.constant 0 : i32
    %c0_i32_0 = arith.constant 0 : i32
    %c0_i32_1 = arith.constant 0 : i32
    return %c0_i32, %c0_i32_0 : i32, i32
  }
  func.func @transform_4(%arg0: i32, %arg1: i32) -> (i32, i32) {
    %c0_i32 = arith.constant 0 : i32
    %c0_i32_0 = arith.constant 0 : i32
    %c0_i32_1 = arith.constant 0 : i32
    return %c0_i32, %c0_i32_0 : i32, i32
  }
  func.func @transform_5(%arg0: i32, %arg1: i32) -> (i32, i32) {
    %c0_i32 = arith.constant 0 : i32
    %c0_i32_0 = arith.constant 0 : i32
    return %arg0, %c0_i32 : i32, i32
  }
}

</mosaic_0001>

<bundles_post_ra>
// kernel: tpu_custom_call.1
= control target key start
LH: loop header
LB: loop body
LE: loop exit
PB: predicated region body
PF: predicated region fallthrough
CT: control target
= control target key end

     0   :  { %s2184_s0 = inlined_call_operand.hbm [shape: f32[256,128], index: 0, kind: input, shape index: {}]   ;;  %s2185_s1 = inlined_call_operand.hbm [shape: f32[256,128], index: 1, kind: input, shape index: {}]   ;;  %s2186_s2 = inlined_call_operand.hbm [shape: bf16[256,256], index: 2, kind: input, shape index: {}]   ;;  %s2187_s3 = inlined_call_operand.hbm [shape: bf16[128,128], index: 3, kind: input, shape index: {}]   ;;  %s2188_s4 = inlined_call_operand.vmem [shape: f32[1,128], index: 4, kind: input, shape index: {}]   ;;  %s2189_s5 = inlined_call_operand.hbm [shape: f32[256,128], index: 5, kind: output, shape index: {}]  }
   0x1   :  { %2212 = sst [smem:[#allocation27_spill]] %s2184_s0 }
   0x2   :  { %2213 = sst [smem:[#allocation28_spill]] %s2185_s1 }
   0x3   :  { %2214 = sst [smem:[#allocation29_spill]] %s2187_s3 }
   0x4   :  { %2215 = sst [smem:[#allocation30_spill]] %s2188_s4 }
   0x5   :  { %2216 = sst [smem:[#allocation31_spill]] %s2189_s5 }
   0x6   :  { %10 = vsyncpa [#allocation4], 0 }
   0x7   :  { %12 = vsyncpa [#allocation4 + $0x1], 0 }
   0x8   :  { %13 = vsyncpa [#allocation7], 0 }
   0x9   :  { %15 = vsyncpa [#allocation7 + $0x1], 0 }
   0xa   :  { %16 = vsyncpa [#allocation10], 0 }
   0xb   :  { %17 = vsyncpa [#allocation5], 0 }
   0xc   :  { %19 = vsyncpa [#allocation5 + $0x1], 0  ;;  %s1657_s18 = smov 0   ;;  %s1659_s19 = smov 0  }
   0xd   :  { %s1661_s20 = smov 0   ;;  %s1663_s21 = smov 0  }
   0xe   :  { %s1665_s22 = smov 0   ;;  %s1667_s23 = smov 0  }
   0xf   :  { %s1669_s24 = smov 0   ;;  %s1671_s25 = smov 0  }
  0x10   :  { %s1673_s26 = smov 0   ;;  %s1675_s27 = smov 0  }
  0x11   :  { %s1677_s28 = smov 0   ;;  %s1679_s29 = smov 0  }
  0x12   :  { %s1681_s30 = smov 0   ;;  %s1683_s6 = smov 0  }
  0x13 LB: > { %2217 = sst [smem:[#allocation17_spill]] %s1581_s23  ;;  %s34_s7 = sadd.s32 1, %s1605_s29  ;;  %s1613_s6 = sphi %s1683_s6, %s25_s6   ;;  %s1609_s30 = sphi %s1681_s30, %s2288_s30   ;;  %s1605_s29 = sphi %s1679_s29, %s2287_s29   ;;  %s1601_s28 = sphi %s1677_s28, %s2286_s28   ;;  %s1597_s27 = sphi %s1675_s27, %s2285_s27   ;;  %s1593_s26 = sphi %s1673_s26, %s2275_s26   ;;  %s1589_s25 = sphi %s1671_s25, %s2284_s25   ;;  %s1585_s24 = sphi %s1669_s24, %s2283_s24   ;;  %s1581_s23 = sphi %s1667_s23, %s2273_s23   ;;  %s1577_s22 = sphi %s1665_s22, %s2282_s22   ;;  %s1573_s21 = sphi %s1663_s21, %s2281_s21   ;;  %s1569_s20 = sphi %s1661_s20, %s2280_s20   ;;  %s1565_s19 = sphi %s1659_s19, %s2279_s19   ;;  %s1561_s18 = sphi %s1657_s18, %s2278_s18  }
  0x14   : > { %2218 = sst [smem:[#allocation18_spill]] %s1585_s24  ;;  %p2193_p0 = scmp.eq.s32.totalorder %s1613_s6, 0 }
  0x15   : > { %2219 = sst [smem:[#allocation19_spill]] %s1593_s26  ;;  %p1729_p1 = scmp.ge.s32.totalorder %s34_s7, 2 }
  0x16   : > { %2220 = sst [smem:[#allocation20_spill]] %s1597_s27  ;;  %s70_s9 = sadd.s32 1, %s1581_s23 }
  0x17   : > { %2221 = sst [smem:[#allocation21_spill]] %s1601_s28  ;;  %p77_p2 = scmp.ne.s32.totalorder %s1581_s23, %s1577_s22 }
  0x18   : > { %s2222_s8 = scalar_select %p1729_p1, 1, 0 }
  0x19   : > { %s2290_s7 = smov (%p1729_p1, %s34_s7), 0  ;;  %p79_p4 = por %p77_p2, %p2193_p0 }
  0x1a   : > { %2223 = sst [smem:[#allocation22_spill]] %s2290_s7  ;;  %s1746_s10 = ssub.s32 %s1605_s29, %s2290_s7 }
  0x1b   : > { %p2192_p5 = scmp.lt.s32.totalorder %s1613_s6, 4  ;;  %p68_p6 = scmp.eq.s32.totalorder %s1746_s10, 0 }
  0x1c   : > { %s240_s11 = sand.u32 1, %s1613_s6   ;;  %s242_s13 = sand.u32 1, %s1581_s23  }
  0x1d   : > { %s1752_s12 = scalar_select %p68_p6, %s1581_s23, %s70_s9  }
  0x1e   : > { %s1030_s14 = sshll.u32 %s242_s13, 7  ;;  %s1068_s15 = sshll.u32 %s1605_s29, 11 }
  0x1f   : > { %2224 = sst [smem:[#allocation23_spill]] %s1752_s12  ;;  %s2225_s1 = sld [smem:[#allocation28_spill]] }
  0x20   : > { %s244_s7 = scalar_lea.vmem [#allocation6], %s1030_s14  ;;  %p1763_p7 = pnand %p2192_p5, %p79_p4 }
  0x21   : > { %s251_s28 = sshll.u32 %s244_s7, 4  ;;  %s1769_s9 = scalar_lea.sflag [#allocation7], %s240_s11  ;;  %s1767_s28 = int_to_ptr.vmem [resolvable:$true] %s251_s28 }
  0x22   : > { %p1339_p9 = pneg %p1763_p7 }
  0x25   : > { %s1759_s5 = scalar_lea.hbm %s2225_s1, %s1068_s15  ;;  %s1342_s15 = scalar_lea.hbm %s2225_s1, 4096 }
  0x26   : > { %s1337_s13 = scalar_lea.hbm %s1759_s5, 2048  ;;  %p1343_p12 = scmp.lt.u32.totalorder %s1759_s5, %s2225_s1 }
  0x27   : > { %p1338_p8 = scmp.ne.s32.totalorder %s1759_s5, %s1337_s13  ;;  %p1344_p13 = scmp.lt.u32.totalorder %s1342_s15, %s1337_s13 }
  0x28   : > { %p1346_p4 = scmp.lt.u32.totalorder %s1337_s13, %s1759_s5 }
  0x29   : > { %p1340_p10 = pnand %p1339_p9, %p1338_p8  ;;  %p1345_p2 = por %p1344_p13, %p1343_p12 }
  0x2b   : > { %p1341_p11 = pneg %p1340_p10  ;;  %p1347_p6 = por %p1346_p4, %p1345_p2 }
  0x2d   : > { %p1348_p5 = pnand %p1347_p6, %p1341_p11 }
  0x2f   : > { %1351 = shalt.err (!%p1348_p5)
}
  0x30   : > { %s1352_s11 = scalar_lea.vmem %s1767_s28, 2048  ;;  %s1615_s7 = smov [#allocation6]  }
  0x31   : > { %p1353_p8 = scmp.ne.s32.totalorder %s1767_s28, %s1352_s11  ;;  %s1357_s14 = sshll.u32 %s1615_s7, 4  ;;  %s1358_s14 = int_to_ptr.vmem [resolvable:$false] %s1357_s14 }
  0x32   : > { %s1359_s16 = scalar_lea.vmem %s1358_s14, 4096  ;;  %p1360_p3 = scmp.lt.s32.totalorder %s1767_s28, %s1358_s14 }
  0x33   : > { %p1355_p10 = pnand %p1353_p8, %p1339_p9  ;;  %p1361_p12 = scmp.lt.s32.totalorder %s1359_s16, %s1352_s11 }
  0x35   : > { %p1356_p0 = pneg %p1355_p10  ;;  %p1362_p13 = por %p1361_p12, %p1360_p3 }
  0x37   : > { %p1363_p2 = pnand %p1362_p13, %p1356_p0 }
  0x39   : > { %1366 = shalt.err (!%p1363_p2)
}
  0x3a   : > { %s2194_s13 = smov 128   ;;  %s2196_s15 = smov 8  }
  0x3b   : > { %1189 = dma.hbm_to_vmem [thread:$0]  (!%p1763_p7), %s1759_s5, 2048, %s1767_s28, %s1769_s9, %s2194_s13, %s2194_s13, %s2196_s15  }
  0x3c   : > { %s1801_s17 = sadd.s32 4294967295, %s1613_s6   ;;  %p111_p0 = scmp.ne.s32.totalorder %s1565_s19, %s1561_s18 }
  0x3d   : > { %p2197_p3 = scmp.eq.s32.totalorder %s1801_s17, 0  ;;  %p1024_p9 = scmp.ge.s32.totalorder %s1613_s6, 1 }
  0x3e   : > { %p190_p11 = scmp.lt.s32.totalorder %s1613_s6, 5  ;;  %p2227_p4 = scmp.ne.s32.totalorder %s1577_s22, %s1573_s21 }
  0x3f   : > { %p1820_p7 = por %p111_p0, %p2197_p3  ;;  %s1618_s18 = smov [#allocation9]  }
  0x40   : > { %p1814_p6 = por %p2227_p4, %p2197_p3  ;;  %p1824_p8 = pnand %p1024_p9, %p190_p11 }
  0x41   : > { %s2229_s5 = scalar_select %p1820_p7, 1, 0 }
  0x42   : > { %s2228_s4 = scalar_select %p1814_p6, 1, 0 }
  0x43   : > { %s2230_s28 = scalar_select %p1824_p8, 1, 0 }
  0x44   : > { %p1179_p10 = pneg %p1824_p8  ;;  %s202_s11 = sshll.u32 %s1618_s18, 4  ;;  %s203_s11 = int_to_ptr.vmem [resolvable:$true] %s202_s11 }
  0x45   : > { %s2232_s3 = sld [smem:[#allocation29_spill]] }
  0x46   : > { %p1832_p12 = pnand %p1179_p10, %p2197_p3 }
  0x48   : > { %p1369_p2 = pneg %p1832_p12 }
  0x4b   : > { %s1367_s16 = scalar_lea.hbm %s2232_s3, 1024 }
  0x4c   : > { %p1368_p13 = scmp.ne.s32.totalorder %s2232_s3, %s1367_s16  ;;  %p1374_p11 = scmp.lt.u32.totalorder %s1367_s16, %s2232_s3 }
  0x4e   : > { %p1370_p0 = pnand %p1369_p2, %p1368_p13 }
  0x50   : > { %p1371_p9 = pneg %p1370_p0 }
  0x52   : > { %p1376_p4 = pnand %p1374_p11, %p1371_p9 }
  0x54   : > { %1379 = shalt.err (!%p1376_p4)
}
  0x55   : > { %s1380_s12 = scalar_lea.vmem %s203_s11, 1024  ;;  %p1388_p7 = scmp.lt.s32.totalorder %s203_s11, %s203_s11 }
  0x56   : > { %p1381_p10 = scmp.ne.s32.totalorder %s203_s11, %s1380_s12  ;;  %p1389_p6 = scmp.lt.s32.totalorder %s1380_s12, %s1380_s12 }
  0x58   : > { %p1383_p3 = pnand %p1381_p10, %p1369_p2  ;;  %p1390_p8 = por %p1389_p6, %p1388_p7 }
  0x5a   : > { %p1384_p5 = pneg %p1383_p3 }
  0x5c   : > { %p1391_p1 = pnand %p1390_p8, %p1384_p5 }
  0x5e   : > { %1394 = shalt.err (!%p1391_p1)
}
  0x5f   : > { %s2202_s13 = smov 64   ;;  %s2203_s1 = smov 4  }
  0x60   : > { %1182 = dma.hbm_to_vmem [thread:$0]  (!%p1832_p12), %s2232_s3, 1024, %s203_s11, [#allocation10], %s2202_s13, %s2202_s13, %s2203_s1  }
  0x61   : > { %s1023_s7 = sadd.s32 4294967294, %s1613_s6   ;;  %s37_s14 = sadd.s32 1, %s1609_s30 }
  0x62   : > { %p2233_p1 = scmp.ne.s32.totalorder %s2222_s8, 0  ;;  %s44_s16 = sadd.s32 1, %s1593_s26 }
  0x63   : > { %p51_p3 = scmp.ne.s32.totalorder %s1593_s26, %s1589_s25  ;;  %p57_p6 = scmp.ne.s32.totalorder %s1589_s25, %s1585_s24 }
  0x64   : > { %s2292_s14 = smov (!%p2233_p1, %s37_s14), %s1609_s30  ;;  %p2234_p7 = scmp.eq.s32.totalorder %s1613_s6, 0 }
  0x65   : > { %p39_p5 = scmp.ge.s32.totalorder %s2292_s14, 2  ;;  %p2236_p13 = scmp.eq.s32.totalorder %s1801_s17, 3 }
  0x66   : > { %p1867_p8 = por %p2234_p7, %p51_p3  ;;  %p2240_p12 = scmp.eq.s32.totalorder %s1801_s17, 0 }
  0x67   : > { %p1873_p2 = por %p2236_p13, %p51_p3  ;;  %s2294_s14 = smov (%p39_p5, %s2292_s14), 0 }
  0x68   : > { %2239 = sst [smem:[#allocation25_spill]] %s2294_s14  ;;  %p1881_p0 = por %p2240_p12, %p57_p6 }
  0x69   : > { %s2237_s18 = scalar_select %p1873_p2, 1, 0 }
  0x6a   : > { %s2241_s8 = scalar_select %p1881_p0, 1, 0 }
  0x6b   : > { %2238 = sst [smem:[#allocation24_spill]] %s2237_s18  ;;  %p183_p9 = scmp.eq.s32.totalorder %s1023_s7, 3 }
  0x6c   : > { %s41_s11 = ssub.s32 %s1609_s30, %s2294_s14  ;;  %s219_s12 = sand.u32 1, %s1593_s26  }
  0x6d   : > { %p42_p11 = scmp.eq.s32.totalorder %s41_s11, 0  ;;  %s95_s15 = sor.u32 %s1746_s10, %s41_s11 }
  0x6e   : > { %p1889_p4 = scmp.eq.s32.totalorder %s95_s15, 0  ;;  %p1893_p10 = por %p183_p9, %p57_p6 }
  0x6f   : > { %s1898_s3 = scalar_select %p42_p11, %s1593_s26, %s44_s16  }
  0x70   : > { %s2243_s1 = scalar_select %p1893_p10, 1, 0 }
  0x71   : > { %2244 = sst [smem:[#allocation26_spill]] %s1898_s3  ;;  %s1027_s23 = sshll.u32 %s219_s12, 7 }
  0x72   : > { %s1067_s24 = sshll.u32 %s1609_s30, 11  ;;  %s2245_s0 = sld [smem:[#allocation27_spill]] }
  0x73   : > { %s223_s10 = scalar_lea.vmem [#allocation3], %s1027_s23  ;;  %p2246_p1 = scmp.lt.s32.totalorder %s1613_s6, 4 }
  0x74   : > { %s230_s11 = sshll.u32 %s223_s10, 4  ;;  %s1069_s15 = sshll.u32 %s1609_s30, 5  ;;  %s1906_s11 = int_to_ptr.vmem [resolvable:$true] %s230_s11 }
  0x75   : > { %p1912_p3 = pnand %p2246_p1, %p1867_p8  ;;  %s1917_s27 = scalar_lea.sflag [#allocation4], %s219_s12 }
  0x77   : > { %p1397_p6 = pneg %p1912_p3 }
  0x78   : > { %s1904_s7 = scalar_lea.hbm %s2245_s0, %s1067_s24  ;;  %s1400_s18 = scalar_lea.hbm %s2245_s0, 4096 }
  0x79   : > { %s1395_s24 = scalar_lea.hbm %s1904_s7, 2048  ;;  %p1401_p8 = scmp.lt.u32.totalorder %s1904_s7, %s2245_s0 }
  0x7a   : > { %p1396_p5 = scmp.ne.s32.totalorder %s1904_s7, %s1395_s24  ;;  %p1402_p12 = scmp.lt.u32.totalorder %s1400_s18, %s1395_s24 }
  0x7b   : > { %p1404_p11 = scmp.lt.u32.totalorder %s1395_s24, %s1904_s7 }
  0x7c   : > { %p1398_p7 = pnand %p1397_p6, %p1396_p5  ;;  %p1403_p9 = por %p1402_p12, %p1401_p8 }
  0x7e   : > { %p1399_p13 = pneg %p1398_p7  ;;  %p1405_p1 = por %p1404_p11, %p1403_p9 }
  0x80   : > { %p1406_p10 = pnand %p1405_p1, %p1399_p13 }
  0x82   : > { %1409 = shalt.err (!%p1406_p10)
}
  0x83   : > { %s1410_s12 = scalar_lea.vmem %s1906_s11, 2048  ;;  %s1621_s23 = smov [#allocation3]  }
  0x84   : > { %p1411_p5 = scmp.ne.s32.totalorder %s1906_s11, %s1410_s12  ;;  %s1415_s21 = sshll.u32 %s1621_s23, 4  ;;  %s1416_s21 = int_to_ptr.vmem [resolvable:$false] %s1415_s21 }
  0x85   : > { %s1417_s14 = scalar_lea.vmem %s1416_s21, 4096  ;;  %p1418_p0 = scmp.lt.s32.totalorder %s1906_s11, %s1416_s21 }
  0x86   : > { %p1413_p7 = pnand %p1411_p5, %p1397_p6  ;;  %p1419_p8 = scmp.lt.s32.totalorder %s1417_s14, %s1410_s12 }
  0x88   : > { %p1414_p2 = pneg %p1413_p7  ;;  %p1420_p12 = por %p1419_p8, %p1418_p0 }
  0x8a   : > { %p1421_p9 = pnand %p1420_p12, %p1414_p2 }
  0x8c   : > { %1424 = shalt.err (!%p1421_p9)
}
  0x8d   : > { %s2248_s24 = smov 8   ;;  %s2249_s18 = smov 128  }
  0x8e   : > { %1186 = dma.hbm_to_vmem [thread:$0]  (!%p1912_p3), %s1904_s7, 2048, %s1906_s11, %s1917_s27, %s2249_s18, %s2249_s18, %s2248_s24  }
  0x8f   : > { %s98_s10 = sadd.s32 1, %s1569_s20  ;;  %p105_p2 = scmp.ne.s32.totalorder %s1569_s20, %s1565_s19 }
  0x90   : > { %s1954_s16 = scalar_select %p1889_p4, %s1569_s20, %s98_s10  }
  0x91   : > { %p2250_p0 = scmp.eq.s32.totalorder %s1613_s6, 0  ;;  %s263_s12 = sand.u32 1, %s1569_s20  }
  0x92   : > { %s1033_s23 = sshll.u32 %s263_s12, 6  ;;  %s271_s21 = sadd.s32 %s1605_s29, %s1069_s15 }
  0x93   : > { %p107_p10 = por %p105_p2, %p2250_p0  ;;  %s1036_s14 = sshll.u32 %s271_s21, 6 }
  0x94   : > { %s1965_s26 = scalar_lea.hbm %s2186_s2, %s1036_s14  ;;  %s265_s7 = scalar_lea.vmem [#allocation8], %s1033_s23 }
  0x95   : > { %s274_s13 = sshll.u32 %s265_s7, 4  ;;  %p2251_p4 = scmp.lt.s32.totalorder %s1613_s6, 4  ;;  %s1967_s13 = int_to_ptr.vmem [resolvable:$true] %s274_s13 }
  0x96   : > { %s1425_s15 = scalar_lea.hbm %s1965_s26, 1024  ;;  %s1430_s27 = scalar_lea.hbm %s2186_s2, 4096 }
  0x97   : > { %p1971_p3 = pnand %p2251_p4, %p107_p10  ;;  %p1426_p6 = scmp.ne.s32.totalorder %s1965_s26, %s1425_s15 }
  0x98   : > { %p1431_p5 = scmp.lt.u32.totalorder %s1965_s26, %s2186_s2  ;;  %p1432_p7 = scmp.lt.u32.totalorder %s1430_s27, %s1425_s15 }
  0x99   : > { %p1427_p13 = pneg %p1971_p3  ;;  %p1434_p12 = scmp.lt.u32.totalorder %s1425_s15, %s1965_s26 }
  0x9a   : > { %p1433_p8 = por %p1432_p7, %p1431_p5 }
  0x9b   : > { %p1428_p11 = pnand %p1427_p13, %p1426_p6 }
  0x9c   : > { %p1435_p9 = por %p1434_p12, %p1433_p8 }
  0x9d   : > { %p1429_p1 = pneg %p1428_p11 }
  0x9f   : > { %p1436_p2 = pnand %p1435_p9, %p1429_p1 }
  0xa1   : > { %1439 = shalt.err (!%p1436_p2)
}
  0xa2   : > { %s1440_s12 = scalar_lea.vmem %s1967_s13, 1024  ;;  %s1622_s23 = smov [#allocation8]  }
  0xa3   : > { %p1441_p0 = scmp.ne.s32.totalorder %s1967_s13, %s1440_s12  ;;  %s1445_s21 = sshll.u32 %s1622_s23, 4  ;;  %s1446_s21 = int_to_ptr.vmem [resolvable:$false] %s1445_s21 }
  0xa4   : > { %s1447_s14 = scalar_lea.vmem %s1446_s21, 2048  ;;  %p1448_p6 = scmp.lt.s32.totalorder %s1967_s13, %s1446_s21 }
  0xa5   : > { %p1443_p10 = pnand %p1441_p0, %p1427_p13  ;;  %p1449_p11 = scmp.lt.s32.totalorder %s1447_s14, %s1440_s12 }
  0xa7   : > { %p1444_p4 = pneg %p1443_p10  ;;  %p1450_p5 = por %p1449_p11, %p1448_p6 }
  0xa9   : > { %p1451_p7 = pnand %p1450_p5, %p1444_p4 }
  0xab   : > { %1454 = shalt.err (!%p1451_p7)
}
  0xac   : > { %s2253_s7 = smov 4   ;;  %s2254_s15 = smov 64  }
  0xad   : > { %1192 = dma.hbm_to_vmem [thread:$0]  (!%p1971_p3), %s1965_s26, 1024, %s1967_s13, %s1769_s9, %s2249_s18, %s2254_s15, %s2253_s7  }
  0xae   : > { %p2255_p13 = scmp.ne.s32.totalorder %s2230_s28, 0 }
  0xaf   : > { %s2007_s0 = sand.u32 (!%p2255_p13), 1, %s1589_s25   ;;  %p2256_p1 = scmp.ne.s32.totalorder (!%p2255_p13), %s2241_s8, 0 }
  0xb0   : > { %286 = sbr.rel (%p2255_p13) target bundleno = 778 (0x30a), region = 40  ;;  %s1038_s3 = sshll.u32 (!%p2255_p13), %s2007_s0, 7 }
  0xb1   : > { %s289_s27 = scalar_lea.sflag (!%p2255_p13), [#allocation4], %s2007_s0  ;;  %s2011_s24 = scalar_lea.vmem (!%p2255_p13), [#allocation3], %s1038_s3 }
  0xb7   : > { %1540 = dma.done.wait (%p2256_p1), %s289_s27, 2048  }
  0xb8   : > { %1542 = vsyncadd (%p2256_p1), %s289_s27, 4294965248  ;;  %s297_s26 = sand.u32 1, %s1801_s17   ;;  %s299_s9 = sand.u32 1, %s1577_s22  }
  0xb9   : > { %s1039_s28 = sshll.u32 %s299_s9, 7  ;;  %s298_s18 = scalar_lea.sflag [#allocation7], %s297_s26 }
  0xba   : > { %s2019_s13 = scalar_lea.vmem [#allocation6], %s1039_s28  ;;  %p2257_p3 = scmp.ne.s32.totalorder %s2228_s4, 0 }
  0xbc   : > { %1544 = dma.done.wait (%p2257_p3), %s298_s18, 2048  }
  0xbd   : > { %1546 = vsyncadd (%p2257_p3), %s298_s18, 4294965248  ;;  %s308_s11 = sand.u32 1, %s1565_s19   ;;  %p2258_p8 = scmp.ne.s32.totalorder %s2229_s5, 0 }
  0xbe   : > { %s1040_s10 = sshll.u32 %s308_s11, 6 }
  0xbf   : > { %s2026_s8 = scalar_lea.vmem [#allocation8], %s1040_s10 }
  0xc0   : > { %1548 = dma.done.wait (%p2258_p8), %s298_s18, 1024  }
  0xc1   : > { %1550 = vsyncadd (%p2258_p8), %s298_s18, 4294966272  ;;  %p2259_p12 = scmp.eq.s32.totalorder %s1801_s17, 0 }
  0xc3   : > { %1552 = dma.done.wait (%p2259_p12), [#allocation10], 1024   ;;  %p2260_p9 = pmov %p2259_p12 }
  0xc4   : > { %s2036_s12 = scalar_lea.vmem [#allocation11], %s1038_s3  ;;  %s2261_s4 = sld [smem:[#allocation20_spill]] }
  0xc5   : > { %1554 = vsyncadd (%p2260_p9), [#allocation10], 4294966272 }
  0xca   : > { %p1043_p2 = scmp.ne.s32.totalorder %s2261_s4, 0 }
  0xcb   : > { %v1623_v0 = vmov (!%p1043_p2), 0.0  }
  0xcc   : > { %359 = sbr.rel (%p1043_p2) target bundleno = 212 (0xd4), region = 60  ;;  %360 = vst [vmem:[#allocation2] sm:$0xff] (!%p1043_p2), %v1623_v0  ;;  %361 = vst [vmem:[#allocation2 + $0x8] sm:$0xff] (!%p1043_p2), %v1623_v0 }
  0xcd   : > { %362 = vst [vmem:[#allocation2 + $0x10] sm:$0xff] (!%p1043_p2), %v1623_v0  ;;  %363 = vst [vmem:[#allocation2 + $0x18] sm:$0xff] (!%p1043_p2), %v1623_v0 }
  0xce   : > { %364 = vst [vmem:[#allocation2 + $0x20] sm:$0xff] (!%p1043_p2), %v1623_v0  ;;  %365 = vst [vmem:[#allocation2 + $0x28] sm:$0xff] (!%p1043_p2), %v1623_v0 }
  0xcf   : > { %366 = vst [vmem:[#allocation2 + $0x30] sm:$0xff] (!%p1043_p2), %v1623_v0  ;;  %367 = vst [vmem:[#allocation2 + $0x38] sm:$0xff] (!%p1043_p2), %v1623_v0 }
  0xd0   : > { %368 = vst [vmem:[#allocation2 + $0x40] sm:$0xff] (!%p1043_p2), %v1623_v0  ;;  %369 = vst [vmem:[#allocation2 + $0x48] sm:$0xff] (!%p1043_p2), %v1623_v0 }
  0xd1   : > { %370 = vst [vmem:[#allocation2 + $0x50] sm:$0xff] (!%p1043_p2), %v1623_v0  ;;  %371 = vst [vmem:[#allocation2 + $0x58] sm:$0xff] (!%p1043_p2), %v1623_v0 }
  0xd2   : > { %372 = vst [vmem:[#allocation2 + $0x60] sm:$0xff] (!%p1043_p2), %v1623_v0  ;;  %373 = vst [vmem:[#allocation2 + $0x68] sm:$0xff] (!%p1043_p2), %v1623_v0 }
  0xd3   : > { %374 = vst [vmem:[#allocation2 + $0x70] sm:$0xff] %v1623_v0  ;;  %375 = vst [vmem:[#allocation2 + $0x78] sm:$0xff] %v1623_v0 }
  0xd4 PF: > { %v1321_v1 = vld [vmem:[#allocation9] sm:$0xff]   ;;  %v1322_v2 = vld [vmem:[#allocation9 + $0x8] sm:$0xff]   ;;  %v1323_v3 = vld [vmem:[#allocation9 + $0x10] sm:$0xff]   ;;  %s2262_s23 = sld [smem:[#allocation30_spill]]  ;;  %s2263_s21 = sld [smem:[#allocation20_spill]] }
  0xd5   : > { %1103 = vmatprep.subr.bf16.mxu0 %v1321_v1  ;;  %v1324_v4 = vld [vmem:[#allocation9 + $0x18] sm:$0xff]   ;;  %v376_v5 = vld [vmem:[%s2019_s13] sm:$0xff]  ;;  %v377_v6 = vld [vmem:[%s2019_s13 + $0x8] sm:$0xff] }
  0xd6   : > { %1104 = vmatpush3.bf16.msra.mxu0 %v1321_v1  ;;  %v392_v7 = vpack.c.bf16 %v377_v6, %v376_v5  ;;  %v1325_v8 = vld [vmem:[#allocation9 + $0x20] sm:$0xff]   ;;  %v1326_v9 = vld [vmem:[#allocation9 + $0x28] sm:$0xff]   ;;  %v1327_v10 = vld [vmem:[#allocation9 + $0x30] sm:$0xff]  }
  0xd7   : > { %1105 = vmatprep.subr.bf16.mxu0 %v1322_v2  ;;  %v1328_v11 = vld [vmem:[#allocation9 + $0x38] sm:$0xff]   ;;  %v378_v12 = vld [vmem:[%s2019_s13 + $0x10] sm:$0xff]  ;;  %v380_v14 = vld [vmem:[%s2019_s13 + $0x20] sm:$0xff] }
  0xd8   : > { %1119 = vmatprep.mubr.bf16.mxu0 %v392_v7  ;;  %v379_v13 = vld [vmem:[%s2019_s13 + $0x18] sm:$0xff]  ;;  %v381_v15 = vld [vmem:[%s2019_s13 + $0x28] sm:$0xff]  ;;  %v382_v18 = vld [vmem:[%s2019_s13 + $0x30] sm:$0xff] }
  0xd9   : > { %v393_v16 = vpack.c.bf16 %v379_v13, %v378_v12  ;;  %v394_v17 = vpack.c.bf16 %v381_v15, %v380_v14  ;;  %v383_v19 = vld [vmem:[%s2019_s13 + $0x38] sm:$0xff]  ;;  %v384_v20 = vld [vmem:[%s2019_s13 + $0x40] sm:$0xff]  ;;  %v385_v21 = vld [vmem:[%s2019_s13 + $0x48] sm:$0xff] }
  0xda   : > { %1106 = vmatpush3.bf16.msra.mxu0 %v1322_v2  ;;  %v395_v22 = vpack.c.bf16 %v383_v19, %v382_v18  ;;  %v396_v23 = vpack.c.bf16 %v385_v21, %v384_v20  ;;  %v386_v24 = vld [vmem:[%s2019_s13 + $0x50] sm:$0xff]  ;;  %v387_v25 = vld [vmem:[%s2019_s13 + $0x58] sm:$0xff]  ;;  %v388_v26 = vld [vmem:[%s2019_s13 + $0x60] sm:$0xff]  ;;  %p1061_p0 = scmp.ne.s32.totalorder %s2263_s21, 1 }
  0xdb   : > { %1107 = vmatprep.subr.bf16.mxu0 %v1323_v3  ;;  %v389_v27 = vld [vmem:[%s2019_s13 + $0x68] sm:$0xff]  ;;  %v397_v28 = vpack.c.bf16 %v387_v25, %v386_v24  ;;  %v390_v30 = vld [vmem:[%s2019_s13 + $0x70] sm:$0xff]  ;;  %v391_v31 = vld [vmem:[%s2019_s13 + $0x78] sm:$0xff] }
  0xdc   : > { %v398_v29 = vpack.c.bf16 %v389_v27, %v388_v26  ;;  %v399_v32 = vpack.c.bf16 %v391_v31, %v390_v30  ;;  %v1329_v33 = vld [vmem:[%s2026_s8] sm:$0xff]   ;;  %v1330_v27 = vld [vmem:[%s2026_s8 + $0x8] sm:$0xff]  }
  0xdd   : > { %1151 = vmatprep.mubr.bf16.mxu1 %v1329_v33  ;;  %v1044_v34 = vld [vmem:[%s2262_s23] ss:$0 sm:$0xff]  ;;  %v1334_v31 = vld [vmem:[%s2026_s8 + $0x28] sm:$0xff]   ;;  %v1336_v33 = vld [vmem:[%s2026_s8 + $0x38] sm:$0xff]  }
  0xde   : > { %1108 = vmatpush3.bf16.msra.mxu0 %v1323_v3  ;;  %v1333_v30 = vld [vmem:[%s2026_s8 + $0x20] sm:$0xff]  }
  0xdf   : > { %1109 = vmatprep.subr.bf16.mxu0 %v1324_v4 }
  0xe2   : > { %1110 = vmatpush3.bf16.msra.mxu0 %v1324_v4 }
  0xe3   : > { %1111 = vmatprep.subr.bf16.mxu0 %v1325_v8 }
  0xe6   : > { %1112 = vmatpush3.bf16.msra.mxu0 %v1325_v8 }
  0xe7   : > { %1113 = vmatprep.subr.bf16.mxu0 %v1326_v9 }
  0xea   : > { %1114 = vmatpush3.bf16.msra.mxu0 %v1326_v9 }
  0xeb   : > { %1115 = vmatprep.subr.bf16.mxu0 %v1327_v10 }
  0xee   : > { %1116 = vmatpush3.bf16.msra.mxu0 %v1327_v10 }
  0xef   : > { %1117 = vmatprep.subr.bf16.mxu0 %v1328_v11 }
  0xf2   : > { %1118 = vmatpush3.bf16.msra.mxu0 %v1328_v11 }
  0xf5   : > { %1120 = vmatmul.mubr.bf16.vlgmr.msra.gmra.mrb[0].mxu0 %v393_v16 }
  0xf6   : > { %1123 = vmatprep.mubr.bf16.mxu0 %v394_v17 }
  0xfd   : > { %1124 = vmatmul.mubr.bf16.gmra.mrb[4].mxu0 %v395_v22 }
  0xfe   : > { %1127 = vmatprep.mubr.bf16.mxu0 %v396_v23 }
 0x105   : > { %1128 = vmatmul.mubr.bf16.gmra.mrb[8].mxu0 %v397_v28  ;;  %v1331_v28 = vld [vmem:[%s2026_s8 + $0x10] sm:$0xff]  }
 0x106   : > { %1131 = vmatprep.mubr.bf16.mxu0 %v398_v29  ;;  %v1332_v29 = vld [vmem:[%s2026_s8 + $0x18] sm:$0xff]  }
 0x10d   : > { %1132 = vmatmul.mubr.bf16.gmra.mrb[12].mxu0 %v399_v32  ;;  %v1335_v32 = vld [vmem:[%s2026_s8 + $0x30] sm:$0xff]  }
 0x1c8   : > { %v1121_v35 = vpop.f32.mrb[0].mxu0 }
 0x1c9   : > { %v514_v36 = vadd.f32 %v1121_v35, %v1044_v34  ;;  %v505_v37 = vpop.f32.mrb[1].mxu0  ;;  %v584_v35 = vld [vmem:[#allocation2] sm:$0xff] }
 0x1ca   : > { %v506_v38 = vadd.f32 %v1044_v34, %v505_v37  ;;  %v1122_v39 = vpop.f32.mrb[2].mxu0  ;;  %v587_v37 = vld [vmem:[#allocation2 + $0x18] sm:$0xff] }
 0x1cb   : > { %v517_v40 = vadd.f32 %v1122_v39, %v1044_v34  ;;  %v508_v41 = vpop.f32.mrb[3].mxu0  ;;  %v570_v43 = vmax.f32 %v514_v36, 0.0 }
 0x1cc   : > { %v509_v42 = vadd.f32 %v1044_v34, %v508_v41  ;;  %v568_v45 = vmax.f32 %v506_v38, 0.0 }
 0x1cd   : > { %v571_v44 = vmax.f32 %v517_v40, 0.0  ;;  %v585_v40 = vld [vmem:[#allocation2 + $0x8] sm:$0xff] }
 0x1ce   : > { %v569_v46 = vmax.f32 %v509_v42, 0.0 }
 0x1cf   : > { %v617_v47 = vpack.c.bf16 %v571_v44, %v570_v43 }
 0x1d0   : > { %v1125_v48 = vpop.f32.mrb[4].mxu0  ;;  %v616_v49 = vpack.c.bf16 %v569_v46, %v568_v45  ;;  %v590_v46 = vld [vmem:[#allocation2 + $0x30] sm:$0xff] }
 0x1d1   : > { %v530_v50 = vadd.f32 %v1125_v48, %v1044_v34  ;;  %v521_v51 = vpop.f32.mrb[5].mxu0 }
 0x1d2   : > { %v522_v52 = vadd.f32 %v1044_v34, %v521_v51  ;;  %v1126_v53 = vpop.f32.mrb[6].mxu0  ;;  %1135 = vmatprep.subr.bf16.mxu1 %v616_v49 }
 0x1d3   : > { %v533_v54 = vadd.f32 %v1126_v53, %v1044_v34  ;;  %v524_v55 = vpop.f32.mrb[7].mxu0  ;;  %1136 = vmatpush3.bf16.msra.mxu1 %v616_v49  ;;  %v574_v57 = vmax.f32 %v530_v50, 0.0  ;;  %v591_v49 = vld [vmem:[#allocation2 + $0x38] sm:$0xff] }
 0x1d4   : > { %v525_v56 = vadd.f32 %v1044_v34, %v524_v55  ;;  %1137 = vmatprep.subr.bf16.mxu1 %v617_v47  ;;  %v572_v59 = vmax.f32 %v522_v52, 0.0  ;;  %v589_v52 = vld [vmem:[#allocation2 + $0x28] sm:$0xff] }
 0x1d5   : > { %v575_v58 = vmax.f32 %v533_v54, 0.0 }
 0x1d6   : > { %v573_v60 = vmax.f32 %v525_v56, 0.0 }
 0x1d7   : > { %v619_v61 = vpack.c.bf16 %v575_v58, %v574_v57  ;;  %1138 = vmatpush3.bf16.msra.mxu1 %v617_v47  ;;  %v588_v47 = vld [vmem:[#allocation2 + $0x20] sm:$0xff]  ;;  %v594_v58 = vld [vmem:[#allocation2 + $0x50] sm:$0xff] }
 0x1d8   : > { %v618_v62 = vpack.c.bf16 %v573_v60, %v572_v59  ;;  %v1129_v63 = vpop.f32.mrb[8].mxu0  ;;  %v592_v59 = vld [vmem:[#allocation2 + $0x40] sm:$0xff] }
 0x1d9   : > { %v546_v0 = vadd.f32 %v1129_v63, %v1044_v34  ;;  %v537_v1 = vpop.f32.mrb[9].mxu0 }
 0x1da   : > { %v538_v2 = vadd.f32 %v1044_v34, %v537_v1  ;;  %v1130_v3 = vpop.f32.mrb[10].mxu0  ;;  %1139 = vmatprep.subr.bf16.mxu1 %v618_v62 }
 0x1db   : > { %v549_v4 = vadd.f32 %v1130_v3, %v1044_v34  ;;  %v540_v5 = vpop.f32.mrb[11].mxu0  ;;  %1140 = vmatpush3.bf16.msra.mxu1 %v618_v62  ;;  %v578_v7 = vmax.f32 %v546_v0, 0.0  ;;  %v593_v0 = vld [vmem:[#allocation2 + $0x48] sm:$0xff] }
 0x1dc   : > { %v541_v6 = vadd.f32 %v1044_v34, %v540_v5  ;;  %1141 = vmatprep.subr.bf16.mxu1 %v619_v61  ;;  %v576_v9 = vmax.f32 %v538_v2, 0.0 }
 0x1dd   : > { %v579_v8 = vmax.f32 %v549_v4, 0.0 }
 0x1de   : > { %v577_v10 = vmax.f32 %v541_v6, 0.0  ;;  %v598_v6 = vld [vmem:[#allocation2 + $0x70] sm:$0xff] }
 0x1df   : > { %v621_v11 = vpack.c.bf16 %v579_v8, %v578_v7  ;;  %1142 = vmatpush3.bf16.msra.mxu1 %v619_v61  ;;  %v595_v61 = vld [vmem:[#allocation2 + $0x58] sm:$0xff]  ;;  %v596_v7 = vld [vmem:[#allocation2 + $0x60] sm:$0xff] }
 0x1e0   : > { %v620_v12 = vpack.c.bf16 %v577_v10, %v576_v9  ;;  %v1133_v13 = vpop.f32.mrb[12].mxu0  ;;  %v599_v9 = vld [vmem:[#allocation2 + $0x78] sm:$0xff] }
 0x1e1   : > { %v562_v14 = vadd.f32 %v1133_v13, %v1044_v34  ;;  %v553_v15 = vpop.f32.mrb[13].mxu0 }
 0x1e2   : > { %v554_v16 = vadd.f32 %v1044_v34, %v553_v15  ;;  %v1134_v17 = vpop.f32.mrb[14].mxu0  ;;  %1143 = vmatprep.subr.bf16.mxu1 %v620_v12 }
 0x1e3   : > { %v565_v18 = vadd.f32 %v1134_v17, %v1044_v34  ;;  %v556_v19 = vpop.f32.mrb[15].mxu0  ;;  %1144 = vmatpush3.bf16.msra.mxu1 %v620_v12  ;;  %v582_v21 = vmax.f32 %v562_v14, 0.0  ;;  %v597_v12 = vld [vmem:[#allocation2 + $0x68] sm:$0xff] }
 0x1e4   : > { %v557_v20 = vadd.f32 %v1044_v34, %v556_v19  ;;  %1145 = vmatprep.subr.bf16.mxu1 %v621_v11  ;;  %v580_v23 = vmax.f32 %v554_v16, 0.0  ;;  %v586_v34 = vld [vmem:[#allocation2 + $0x10] sm:$0xff] }
 0x1e5   : > { %v583_v22 = vmax.f32 %v565_v18, 0.0  ;;  %v805_v18 = vld [vmem:[%s2011_s24] sm:$0xff] (!%p1061_p0) }
 0x1e6   : > { %v581_v24 = vmax.f32 %v557_v20, 0.0  ;;  %v806_v20 = vld [vmem:[%s2011_s24 + $0x8] sm:$0xff] (!%p1061_p0) }
 0x1e7   : > { %v623_v25 = vpack.c.bf16 %v583_v22, %v582_v21  ;;  %1146 = vmatpush3.bf16.msra.mxu1 %v621_v11 }
 0x1e8   : > { %v622_v26 = vpack.c.bf16 %v581_v24, %v580_v23  ;;  %v807_v23 = vld [vmem:[%s2011_s24 + $0x10] sm:$0xff] (!%p1061_p0) }
 0x1ea   : > { %1147 = vmatprep.subr.bf16.mxu1 %v622_v26 }
 0x1eb   : > { %1148 = vmatpush3.bf16.msra.mxu1 %v622_v26 }
 0x1ec   : > { %1149 = vmatprep.subr.bf16.mxu1 %v623_v25 }
 0x1ef   : > { %1150 = vmatpush3.bf16.msra.mxu1 %v623_v25 }
 0x1f2   : > { %1152 = vmatmul.mubr.bf16.vlgmr.msra.gmra.mrb[0].mxu1 %v1330_v27  ;;  %v808_v27 = vld [vmem:[%s2011_s24 + $0x18] sm:$0xff] (!%p1061_p0) }
 0x1f3   : > { %1155 = vmatprep.mubr.bf16.mxu1 %v1331_v28 }
 0x1fa   : > { %1156 = vmatmul.mubr.bf16.gmra.mrb[4].mxu1 %v1332_v29  ;;  %v809_v29 = vld [vmem:[%s2011_s24 + $0x20] sm:$0xff] (!%p1061_p0) }
 0x1fb   : > { %1159 = vmatprep.mubr.bf16.mxu1 %v1333_v30 }
 0x202   : > { %1160 = vmatmul.mubr.bf16.gmra.mrb[8].mxu1 %v1334_v31 }
 0x203   : > { %1163 = vmatprep.mubr.bf16.mxu1 %v1335_v32  ;;  %v810_v32 = vld [vmem:[%s2011_s24 + $0x28] sm:$0xff] (!%p1061_p0) }
 0x20a   : > { %1164 = vmatmul.mubr.bf16.gmra.mrb[12].mxu1 %v1336_v33 }
 0x2c5   : > { %v1153_v36 = vpop.f32.mrb[0].mxu1 }
 0x2c6   : > { %v771_v38 = vadd.f32 %v1153_v36, %v586_v34  ;;  %v706_v39 = vpop.f32.mrb[1].mxu1  ;;  %v811_v36 = vld [vmem:[%s2011_s24 + $0x30] sm:$0xff] (!%p1061_p0) }
 0x2c7   : > { %v769_v41 = vadd.f32 %v706_v39, %v584_v35  ;;  %v1154_v42 = vpop.f32.mrb[2].mxu1 }
 0x2c8   : > { %787 = vst [vmem:[#allocation2 + $0x10] sm:$0xff] %v771_v38  ;;  %v772_v43 = vadd.f32 %v1154_v42, %v587_v37  ;;  %v709_v44 = vpop.f32.mrb[3].mxu1  ;;  %v812_v38 = vld [vmem:[%s2011_s24 + $0x38] sm:$0xff] (!%p1061_p0) }
 0x2c9   : > { %785 = vst [vmem:[#allocation2] sm:$0xff] %v769_v41  ;;  %v770_v45 = vadd.f32 %v709_v44, %v585_v40  ;;  %v813_v41 = vld [vmem:[%s2011_s24 + $0x40] sm:$0xff] (!%p1061_p0) }
 0x2ca   : > { %788 = vst [vmem:[#allocation2 + $0x18] sm:$0xff] %v772_v43 }
 0x2cb   : > { %786 = vst [vmem:[#allocation2 + $0x8] sm:$0xff] %v770_v45  ;;  %v814_v45 = vld [vmem:[%s2011_s24 + $0x48] sm:$0xff] (!%p1061_p0) }
 0x2cd   : > { %v1157_v48 = vpop.f32.mrb[4].mxu1 }
 0x2ce   : > { %v775_v50 = vadd.f32 %v1157_v48, %v590_v46  ;;  %v722_v51 = vpop.f32.mrb[5].mxu1 }
 0x2cf   : > { %v773_v53 = vadd.f32 %v722_v51, %v588_v47  ;;  %v1158_v54 = vpop.f32.mrb[6].mxu1  ;;  %v823_v24 = vld [vmem:[#allocation2 + $0x10] sm:$0xff] (!%p1061_p0) }
 0x2d0   : > { %791 = vst [vmem:[#allocation2 + $0x30] sm:$0xff] %v775_v50  ;;  %v776_v55 = vadd.f32 %v1158_v54, %v591_v49  ;;  %v725_v56 = vpop.f32.mrb[7].mxu1  ;;  %v821_v19 = vld [vmem:[#allocation2] sm:$0xff] (!%p1061_p0)  ;;  %v839_v26 = vadd.f32 (!%p1061_p0), %v823_v24, %v807_v23  ;;  %v815_v47 = vld [vmem:[%s2011_s24 + $0x50] sm:$0xff] (!%p1061_p0)  ;;  %v816_v50 = vld [vmem:[%s2011_s24 + $0x58] sm:$0xff] (!%p1061_p0) }
 0x2d1   : > { %789 = vst [vmem:[#allocation2 + $0x20] sm:$0xff] %v773_v53  ;;  %v774_v57 = vadd.f32 %v725_v56, %v589_v52  ;;  %v837_v21 = vadd.f32 (!%p1061_p0), %v821_v19, %v805_v18  ;;  %v824_v28 = vld [vmem:[#allocation2 + $0x18] sm:$0xff] (!%p1061_p0)  ;;  %v817_v54 = vld [vmem:[%s2011_s24 + $0x60] sm:$0xff] (!%p1061_p0)  ;;  %v818_v56 = vld [vmem:[%s2011_s24 + $0x68] sm:$0xff] (!%p1061_p0) }
 0x2d2   : > { %792 = vst [vmem:[#allocation2 + $0x38] sm:$0xff] %v776_v55  ;;  %v822_v22 = vld [vmem:[#allocation2 + $0x8] sm:$0xff] (!%p1061_p0)  ;;  %v840_v30 = vadd.f32 (!%p1061_p0), %v824_v28, %v808_v27  ;;  %855 = vst [vmem:[%s2036_s12 + $0x10] sm:$0xff] (!%p1061_p0), %v839_v26 }
 0x2d3   : > { %790 = vst [vmem:[#allocation2 + $0x28] sm:$0xff] %v774_v57  ;;  %v838_v25 = vadd.f32 (!%p1061_p0), %v822_v22, %v806_v20  ;;  %853 = vst [vmem:[%s2036_s12] sm:$0xff] (!%p1061_p0), %v837_v21 }
 0x2d4   : > { %856 = vst [vmem:[%s2036_s12 + $0x18] sm:$0xff] (!%p1061_p0), %v840_v30 }
 0x2d5   : > { %v1161_v60 = vpop.f32.mrb[8].mxu1  ;;  %854 = vst [vmem:[%s2036_s12 + $0x8] sm:$0xff] (!%p1061_p0), %v838_v25 }
 0x2d6   : > { %v779_v62 = vadd.f32 %v1161_v60, %v594_v58  ;;  %v738_v63 = vpop.f32.mrb[9].mxu1 }
 0x2d7   : > { %v777_v1 = vadd.f32 %v738_v63, %v592_v59  ;;  %v1162_v2 = vpop.f32.mrb[10].mxu1  ;;  %v827_v37 = vld [vmem:[#allocation2 + $0x30] sm:$0xff] (!%p1061_p0)  ;;  %v820_v63 = vld [vmem:[%s2011_s24 + $0x78] sm:$0xff] (!%p1061_p0) }
 0x2d8   : > { %795 = vst [vmem:[#allocation2 + $0x50] sm:$0xff] %v779_v62  ;;  %v780_v3 = vadd.f32 %v1162_v2, %v595_v61  ;;  %v741_v4 = vpop.f32.mrb[11].mxu1  ;;  %v825_v31 = vld [vmem:[#allocation2 + $0x20] sm:$0xff] (!%p1061_p0)  ;;  %v843_v39 = vadd.f32 (!%p1061_p0), %v827_v37, %v811_v36  ;;  %v819_v59 = vld [vmem:[%s2011_s24 + $0x70] sm:$0xff] (!%p1061_p0) }
 0x2d9   : > { %793 = vst [vmem:[#allocation2 + $0x40] sm:$0xff] %v777_v1  ;;  %v778_v5 = vadd.f32 %v741_v4, %v593_v0  ;;  %v841_v34 = vadd.f32 (!%p1061_p0), %v825_v31, %v809_v29  ;;  %v828_v40 = vld [vmem:[#allocation2 + $0x38] sm:$0xff] (!%p1061_p0) }
 0x2da   : > { %796 = vst [vmem:[#allocation2 + $0x58] sm:$0xff] %v780_v3  ;;  %v826_v33 = vld [vmem:[#allocation2 + $0x28] sm:$0xff] (!%p1061_p0)  ;;  %v844_v43 = vadd.f32 (!%p1061_p0), %v828_v40, %v812_v38  ;;  %859 = vst [vmem:[%s2036_s12 + $0x30] sm:$0xff] (!%p1061_p0), %v843_v39 }
 0x2db   : > { %794 = vst [vmem:[#allocation2 + $0x48] sm:$0xff] %v778_v5  ;;  %v842_v35 = vadd.f32 (!%p1061_p0), %v826_v33, %v810_v32  ;;  %857 = vst [vmem:[%s2036_s12 + $0x20] sm:$0xff] (!%p1061_p0), %v841_v34 }
 0x2dc   : > { %860 = vst [vmem:[%s2036_s12 + $0x38] sm:$0xff] (!%p1061_p0), %v844_v43 }
 0x2dd   : > { %v1165_v8 = vpop.f32.mrb[12].mxu1  ;;  %804 = sbr.rel (%p1061_p0) target bundleno = 750 (0x2ee), region = 64  ;;  %858 = vst [vmem:[%s2036_s12 + $0x28] sm:$0xff] (!%p1061_p0), %v842_v35 }
 0x2de   : > { %v783_v10 = vadd.f32 %v1165_v8, %v598_v6  ;;  %v754_v11 = vpop.f32.mrb[13].mxu1 }
 0x2df   : > { %v781_v13 = vadd.f32 %v754_v11, %v596_v7  ;;  %v1166_v14 = vpop.f32.mrb[14].mxu1  ;;  %v831_v49 = vld [vmem:[#allocation2 + $0x50] sm:$0xff] (!%p1061_p0) }
 0x2e0   : > { %799 = vst [vmem:[#allocation2 + $0x70] sm:$0xff] %v783_v10  ;;  %v784_v15 = vadd.f32 %v1166_v14, %v599_v9  ;;  %v757_v16 = vpop.f32.mrb[15].mxu1  ;;  %v829_v42 = vld [vmem:[#allocation2 + $0x40] sm:$0xff] (!%p1061_p0)  ;;  %v847_v52 = vadd.f32 (!%p1061_p0), %v831_v49, %v815_v47 }
 0x2e1   : > { %797 = vst [vmem:[#allocation2 + $0x60] sm:$0xff] %v781_v13  ;;  %v782_v17 = vadd.f32 %v757_v16, %v597_v12  ;;  %v845_v44 = vadd.f32 (!%p1061_p0), %v829_v42, %v813_v41  ;;  %v832_v51 = vld [vmem:[#allocation2 + $0x58] sm:$0xff] (!%p1061_p0) }
 0x2e2   : > { %800 = vst [vmem:[#allocation2 + $0x78] sm:$0xff] %v784_v15  ;;  %v830_v46 = vld [vmem:[#allocation2 + $0x48] sm:$0xff] (!%p1061_p0)  ;;  %v848_v53 = vadd.f32 (!%p1061_p0), %v832_v51, %v816_v50  ;;  %863 = vst [vmem:[%s2036_s12 + $0x50] sm:$0xff] (!%p1061_p0), %v847_v52 }
 0x2e3   : > { %798 = vst [vmem:[#allocation2 + $0x68] sm:$0xff] %v782_v17  ;;  %v846_v48 = vadd.f32 (!%p1061_p0), %v830_v46, %v814_v45  ;;  %861 = vst [vmem:[%s2036_s12 + $0x40] sm:$0xff] (!%p1061_p0), %v845_v44 }
 0x2e4   : > { %864 = vst [vmem:[%s2036_s12 + $0x58] sm:$0xff] %v848_v53 }
 0x2e5   : > { %862 = vst [vmem:[%s2036_s12 + $0x48] sm:$0xff] %v846_v48 }
 0x2e7   : > { %v835_v60 = vld [vmem:[#allocation2 + $0x70] sm:$0xff] }
 0x2e8   : > { %v833_v55 = vld [vmem:[#allocation2 + $0x60] sm:$0xff]  ;;  %v851_v62 = vadd.f32 %v835_v60, %v819_v59 }
 0x2e9   : > { %v849_v57 = vadd.f32 %v833_v55, %v817_v54  ;;  %v836_v0 = vld [vmem:[#allocation2 + $0x78] sm:$0xff] }
 0x2ea   : > { %v834_v58 = vld [vmem:[#allocation2 + $0x68] sm:$0xff]  ;;  %v852_v1 = vadd.f32 %v836_v0, %v820_v63  ;;  %867 = vst [vmem:[%s2036_s12 + $0x70] sm:$0xff] %v851_v62 }
 0x2eb   : > { %v850_v61 = vadd.f32 %v834_v58, %v818_v56  ;;  %865 = vst [vmem:[%s2036_s12 + $0x60] sm:$0xff] %v849_v57 }
 0x2ec   : > { %868 = vst [vmem:[%s2036_s12 + $0x78] sm:$0xff] %v852_v1 }
 0x2ed   : > { %866 = vst [vmem:[%s2036_s12 + $0x68] sm:$0xff] %v850_v61 }
 0x2ee PF: > { %s2264_s14 = sld [smem:[#allocation21_spill]]  ;;  %s2265_s7 = sld [smem:[#allocation24_spill]] }
 0x2ef   : > { %s2266_s26 = sld [smem:[#allocation31_spill]]  ;;  %s883_s18 = sshll.u32 %s2036_s12, 4  ;;  %s2106_s18 = int_to_ptr.vmem [resolvable:$true] %s883_s18 }
 0x2f0   : > { %s870_s24 = scalar_lea.sflag [#allocation5], %s2007_s0  ;;  %s1455_s13 = scalar_lea.vmem %s2106_s18, 2048 }
 0x2f1   : > { %p1456_p10 = scmp.ne.s32.totalorder %s2106_s18, %s1455_s13  ;;  %s1624_s11 = smov [#allocation11]  }
 0x2f2   : > { %s1459_s10 = sshll.u32 %s1624_s11, 4  ;;  %s1460_s10 = int_to_ptr.vmem [resolvable:$false] %s1459_s10 }
 0x2f3   : > { %s1461_s8 = scalar_lea.vmem %s1460_s10, 4096  ;;  %p1462_p5 = scmp.lt.s32.totalorder %s2106_s18, %s1460_s10 }
 0x2f4   : > { %s1070_s15 = sshll.u32 %s2264_s14, 11  ;;  %p2268_p4 = scmp.ne.s32.totalorder %s2265_s7, 0 }
 0x2f5   : > { %s2267_s9 = smov %s2266_s26  ;;  %s2103_s28 = scalar_lea.hbm %s2266_s26, %s1070_s15 }
 0x2f6   : > { %p1457_p6 = pnand %p1456_p10, %p2268_p4  ;;  %p1463_p7 = scmp.lt.s32.totalorder %s1461_s8, %s1455_s13 }
 0x2f8   : > { %p1458_p11 = pneg %p1457_p6  ;;  %p1464_p13 = por %p1463_p7, %p1462_p5 }
 0x2fa   : > { %p1465_p1 = pnand %p1464_p13, %p1458_p11 }
 0x2fc   : > { %1468 = shalt.err (!%p1465_p1)
}
 0x2fd   : > { %s1469_s12 = scalar_lea.hbm %s2103_s28, 2048  ;;  %s1473_s5 = scalar_lea.hbm %s2267_s9, 4096 }
 0x2fe   : > { %p1470_p3 = scmp.ne.s32.totalorder %s2103_s28, %s1469_s12  ;;  %p1474_p9 = scmp.lt.u32.totalorder %s2103_s28, %s2267_s9 }
 0x2ff   : > { %p1475_p2 = scmp.lt.u32.totalorder %s1473_s5, %s1469_s12  ;;  %p1477_p10 = scmp.lt.u32.totalorder %s1469_s12, %s2103_s28 }
 0x300   : > { %p1471_p8 = pnand %p1470_p3, %p2268_p4 }
 0x301   : > { %p1476_p0 = por %p1475_p2, %p1474_p9 }
 0x302   : > { %p1472_p12 = pneg %p1471_p8 }
 0x303   : > { %p1478_p6 = por %p1477_p10, %p1476_p0 }
 0x305   : > { %p1479_p11 = pnand %p1478_p6, %p1472_p12 }
 0x307   : > { %1482 = shalt.err (!%p1479_p11)
}
 0x308   : > { %s1625_s14 = smov 128   ;;  %s1626_s15 = smov 8  }
 0x309   : > { %1177 = dma.vmem_to_hbm [thread:$0]  (%p2268_p4), %s2106_s18, 2048, %s2103_s28, %s870_s24, %s1625_s14, %s1625_s14, %s1626_s15  }
 0x30a PF: > { %s2269_s3 = sld [smem:[#allocation18_spill]]  ;;  %p1200_p5 = scmp.ge.s32.totalorder %s1613_s6, 2 }
 0x30b   : > { %p2270_p7 = scmp.ne.s32.totalorder %s2243_s1, 0 }
 0x30d   : > { %p1194_p13 = pnand %p1200_p5, %p2270_p7 }
 0x310   : > { %s898_s27 = sand.u32 1, %s2269_s3  }
 0x311   : > { %s899_s26 = scalar_lea.sflag [#allocation5], %s898_s27 }
 0x312   : > { %1556 = dma.done.wait (!%p1194_p13), %s899_s26, 2048  }
 0x313   : > { %1558 = vsyncadd (!%p1194_p13), %s899_s26, 4294965248  ;;  %s25_s6 = sadd.s32 1, %s1613_s6   ;;  %s2272_s0 = sld [smem:[#allocation17_spill]] }
 0x314   : > { %p2137_p1 = scmp.ge.s32.totalorder %s25_s6, 6   ;;  %s2273_s23 = sld [smem:[#allocation23_spill]] }
 0x315   : > { %s2274_s7 = sld [smem:[#allocation19_spill]]  ;;  %s2275_s26 = sld [smem:[#allocation26_spill]] }
 0x316   : > { %s2276_s1 = sld [smem:[#allocation22_spill]]  ;;  %s2277_s11 = sld [smem:[#allocation25_spill]] }
 0x317   : > { %s2278_s18 = smov %s1565_s19  ;;  %s2279_s19 = smov %s1569_s20 }
 0x318   : > { %s2280_s20 = smov %s1954_s16  ;;  %s2281_s21 = smov %s1577_s22 }
 0x319   : > { %s2282_s22 = smov %s2272_s0  ;;  %s2283_s24 = smov %s1589_s25 }
 0x31a   : > { %s2285_s27 = smov %s1605_s29  ;;  %s2286_s28 = smov %s1609_s30 }
 0x31b   : > { %s2284_s25 = smov %s2274_s7  ;;  %24 = sbr.rel (!%p2137_p1) target bundleno = 19 (0x13), region = 121 }
 0x31c   : > { %s2287_s29 = smov %s2276_s1  ;;  %s2288_s30 = smov %s2277_s11 }
 0x322   :  { %904 = vsyncpa [#allocation4], 1 }
 0x323   :  { %906 = vsyncpa [#allocation4 + $0x1], 1 }
 0x324   :  { %907 = vsyncpa [#allocation7], 1 }
 0x325   :  { %909 = vsyncpa [#allocation7 + $0x1], 1 }
 0x326   :  { %910 = vsyncpa [#allocation10], 1 }
 0x327   :  { %911 = vsyncpa [#allocation5], 1 }
 0x328   :  { %913 = vsyncpa [#allocation5 + $0x1], 1 }

</bundles_post_ra>
